<compile_context>
chip_gen: v5e
topology: v5e:2x2
jax: 0.10.0
libtpu: 0.0.40
codegen_flags: <defaults>
</compile_context>

<pallas_src>
import functools

import jax
import jax.numpy as jnp
from jax.experimental import pallas as pl
from jax.experimental.pallas import tpu as pltpu


def _gcn2_kernel(a_ref, xt_ref, dinv_ref, p_ref, ot_ref):
    # a_ref   : (1, L, L) bf16  block-diagonal (A_g + I); binary values -> exact in bf16
    # xt_ref  : (1, 1, L) f32   node features, feature-major (lane-dense)
    # dinv_ref: (1, 1, L) f32   D^-1/2 per node (D = degree of A+I)
    # p_ref   : (10,)    f32    SMEM: [w1(3), b1(3), w2(3), b2(1)]
    # ot_ref  : (1, 1, L) f32   output logits, feature-major (lane-dense store)
    a = a_ref[0]                        # [L, L] bf16 — fed straight to the MXU, never upcast
    dinv = dinv_ref[0]                  # [1, L] f32
    xt = xt_ref[0]                      # [1, L] f32

    # ---- layer 1: h1^T = relu(W1^T (A_hat x)^T + b1^T) -----------------------------
    # A_hat is symmetric, so (A_hat x)^T = ((x^T * dinv) @ (A+I)) * dinv : the D^-1/2
    # normalization is fused here as O(L) activation scaling instead of O(L^2) on A.
    xs = (xt * dinv).astype(jnp.bfloat16)
    agg1 = jnp.dot(xs, a, preferred_element_type=jnp.float32) * dinv          # [1, L]
    # 1 -> 3 projection on the VPU (SMEM scalars; a K=1 matmul would waste the MXU)
    h1 = jnp.concatenate(
        [jnp.maximum(p_ref[0] * agg1 + p_ref[3], 0.0),
         jnp.maximum(p_ref[1] * agg1 + p_ref[4], 0.0),
         jnp.maximum(p_ref[2] * agg1 + p_ref[5], 0.0)], axis=0)                # [3, L]

    # ---- layer 2: out^T = relu(W2^T (A_hat h1)^T + b2) ------------------------------
    h1s = (h1 * dinv).astype(jnp.bfloat16)
    agg2 = jnp.dot(h1s, a, preferred_element_type=jnp.float32) * dinv         # [3, L]
    # 3 -> 1 projection on the VPU: weighted sum of the three feature rows
    h2 = (p_ref[6] * agg2[0:1] + p_ref[7] * agg2[1:2]
          + p_ref[8] * agg2[2:3] + p_ref[9])                                  # [1, L]
    ot_ref[0] = jnp.maximum(h2, 0.0).astype(ot_ref.dtype)


def _aug_and_dinv(adj):
    """(A + I) and D^-1/2 with D = row-degree of (A + I), per graph (plain JAX glue)."""
    n = adj.shape[-1]
    a_aug = adj + jnp.eye(n, dtype=adj.dtype)
    deg = jnp.sum(a_aug, axis=-1, keepdims=True)                 # [..., N, 1]
    dinv = jax.lax.rsqrt(jnp.maximum(deg, 1e-12))
    return a_aug, dinv


@functools.partial(jax.jit, static_argnames=("assume_symmetric", "lane_target"))
def gcn_protein_forward(adj, feat, w1, b1, w2, b2, *,
                        assume_symmetric=True, lane_target=128):
    """adj: raw adjacency [N,N] or [B,N,N] (no self-loops required); feat: [N,1]/[B,N,1].

    lane_target: packed lane width per grid step (128 fills a v5e MXU pass; use 256 to
    fill the 2x256^2 MXUs on v6e/v7x when the batch is large enough).
    """
    squeeze_batch = adj.ndim == 2
    if squeeze_batch:
        adj, feat = adj[None], feat[None]
    B, N, _ = adj.shape

    gpb = max(1, lane_target // N)        # graphs packed per grid step
    G = -(-B // gpb)                      # number of grid steps ("parallel" axis)
    L = gpb * N                           # lane width of one packed block

    a_aug, dinv = _aug_and_dinv(adj.astype(jnp.float32))         # [B,N,N], [B,N,1]
    if not assume_symmetric:
        # x^T @ M trick needs M = (A+I)^T when A is not symmetric
        a_aug = jnp.swapaxes(a_aug, -1, -2)

    pad = G * gpb - B
    if pad:                               # pad with isolated dummy graphs (discarded below)
        a_aug = jnp.concatenate(
            [a_aug, jnp.broadcast_to(jnp.eye(N, dtype=a_aug.dtype), (pad, N, N))], axis=0)
        dinv = jnp.concatenate([dinv, jnp.ones((pad, N, 1), dinv.dtype)], axis=0)
        feat = jnp.concatenate([feat, jnp.zeros((pad, N, 1), feat.dtype)], axis=0)

    # Block-diagonal packing [G, gpb, N, N] -> [G, L, L]; binary entries are exact in bf16.
    eye_g = jnp.eye(gpb, dtype=a_aug.dtype)
    a_pack = jnp.einsum('pq,gpij->gpiqj', eye_g,
                        a_aug.reshape(G, gpb, N, N)).reshape(G, L, L).astype(jnp.bfloat16)
    xt_pack = feat.astype(jnp.float32).reshape(G, 1, L)          # feature-major, lane-dense
    dinv_pack = dinv.astype(jnp.float32).reshape(G, 1, L)
    params = jnp.concatenate([w1.reshape(-1), b1.reshape(-1),
                              w2.reshape(-1), b2.reshape(-1)]).astype(jnp.float32)  # (10,)

    out_t = pl.pallas_call(
        _gcn2_kernel,
        out_shape=jax.ShapeDtypeStruct((G, 1, L), jnp.float32),
        grid=(G,),
        in_specs=[
            pl.BlockSpec((1, L, L), lambda i: (i, 0, 0)),        # packed (A+I) block
            pl.BlockSpec((1, 1, L), lambda i: (i, 0, 0)),        # packed features
            pl.BlockSpec((1, 1, L), lambda i: (i, 0, 0)),        # packed D^-1/2
            pl.BlockSpec(memory_space=pltpu.MemorySpace.SMEM),   # 10 weight/bias scalars
        ],
        out_specs=pl.BlockSpec((1, 1, L), lambda i: (i, 0, 0)),
        compiler_params=pltpu.CompilerParams(dimension_semantics=("parallel",)),
    )(a_pack, xt_pack, dinv_pack, params)

    out = out_t.reshape(G * gpb, N, 1)[:B]                       # unpack, drop padding
    return out[0] if squeeze_batch else out


# ------------------------------ references for testing ------------------------------
def _reference_mirrored(adj, feat, w1, b1, w2, b2):
    """Per-graph pure-JAX reference replicating the kernel numerics
    (bf16 MXU operands, f32 accumulation / activations / scaling)."""
    bf = lambda v: v.astype(jnp.bfloat16).astype(jnp.float32)
    a_aug, dinv = _aug_and_dinv(adj.astype(jnp.float32))         # [B,N,N], [B,N,1]
    a = bf(a_aug)                                                # binary -> exact
    dinv_t = jnp.swapaxes(dinv, -1, -2)                          # [B,1,N]
    xt = jnp.swapaxes(feat, -1, -2).astype(jnp.float32)          # [B,1,N]
    agg1 = jnp.einsum('buk,bkn->bun', bf(xt * dinv_t), a) * dinv_t          # [B,1,N]
    h1 = jnp.maximum(w1.reshape(1, 3, 1) * agg1 + b1.reshape(1, 3, 1), 0.0)  # [B,3,N]
    agg2 = jnp.einsum('bfk,bkn->bfn', bf(h1 * dinv_t), a) * dinv_t          # [B,3,N]
    h2 = jnp.sum(w2.reshape(1, 3, 1) * agg2, axis=1, keepdims=True) + b2.reshape(1, 1, 1)
    return jnp.swapaxes(jnp.maximum(h2, 0.0), -1, -2)            # [B,N,1]


def _reference_exact(adj, feat, w1, b1, w2, b2):
    """Ideal f32 math of the PyTorch module: relu(A_hat @ relu(A_hat @ X @ W1 + b1) @ W2 + b2)."""
    a_aug, dinv = _aug_and_dinv(adj.astype(jnp.float32))
    a_hat = a_aug * dinv * jnp.swapaxes(dinv, -1, -2)            # D^-1/2 (A+I) D^-1/2
    h1 = jnp.maximum(jnp.einsum('bij,bjf->bif', a_hat, feat @ w1) + b1, 0.0)
    return jnp.maximum(jnp.einsum('bij,bjf->bif', a_hat, h1 @ w2) + b2, 0.0)


if __name__ == "__main__":
    key = jax.random.PRNGKey(0)
    k_adj, k_feat, k_w1, k_b1, k_w2, k_b2 = jax.random.split(key, 6)

    B, N = 8, 16  # 8 protein graphs of 16 nodes -> one 128-lane block-diagonal step

    # random symmetric binary adjacencies (no self loops; +I added inside the wrapper)
    raw = (jax.random.uniform(k_adj, (B, N, N)) < 0.3).astype(jnp.float32)
    adj = jnp.maximum(raw, jnp.swapaxes(raw, -1, -2)) * (1.0 - jnp.eye(N, dtype=jnp.float32))

    feat = jax.random.normal(k_feat, (B, N, 1), dtype=jnp.float32)
    w1 = jax.random.normal(k_w1, (1, 3), dtype=jnp.float32) * 0.5
    b1 = jax.random.normal(k_b1, (1, 3), dtype=jnp.float32) * 0.1
    w2 = jax.random.normal(k_w2, (3, 1), dtype=jnp.float32) * 0.5
    b2 = jax.random.normal(k_b2, (1, 1), dtype=jnp.float32) * 0.1

    out = jax.block_until_ready(gcn_protein_forward(adj, feat, w1, b1, w2, b2))
    assert out.shape == (B, N, 1)

    # (1) Numerics-mirrored reference (identical bf16 MXU operands): slack only covers
    #     accumulation-order / last-ulp rounding differences between Mosaic and XLA.
    ref_m = _reference_mirrored(adj, feat, w1, b1, w2, b2)
    assert jnp.allclose(out, ref_m, atol=2e-3, rtol=1e-3)
    # (2) Exact-f32 reference: bounds the total bf16-operand error of the kernel.
    ref_x = _reference_exact(adj, feat, w1, b1, w2, b2)
    assert jnp.allclose(out, ref_x, atol=2e-2, rtol=2e-2)

    print("KERNEL_OK")
</pallas_src>

<mosaic_0001>
module attributes {stable_mosaic.version = 11 : i64} {
  func.func @_gcn2_kernel(%arg0: i32, %arg1: memref<1x128x128xbf16, #tpu.memory_space<vmem>>, %arg2: memref<1x1x128xf32, #tpu.memory_space<vmem>>, %arg3: memref<1x1x128xf32, #tpu.memory_space<vmem>>, %arg4: memref<10xf32, #tpu.memory_space<smem>>, %arg5: memref<1x1x128xf32, #tpu.memory_space<vmem>>) attributes {dimension_semantics = [#tpu.dimension_semantics<parallel>], iteration_bounds = array<i64: 1>, scalar_prefetch = 0 : i64, scratch_operands = 0 : i64, tpu.core_type = #tpu.core_type<tc>, window_params = [{transform_indices = @transform_0, window_bounds = array<i64: 1, 128, 128>}, {transform_indices = @transform_1, window_bounds = array<i64: 1, 1, 128>}, {transform_indices = @transform_2, window_bounds = array<i64: 1, 1, 128>}, {transform_indices = @transform_3, window_bounds = array<i64: 10>}, {transform_indices = @transform_4, window_bounds = array<i64: 1, 1, 128>}]} {
    %c0 = arith.constant 0 : index
    %c0_0 = arith.constant 0 : index
    %c0_1 = arith.constant 0 : index
    %0 = vector.load %arg1[%c0, %c0_0, %c0_1] : memref<1x128x128xbf16, #tpu.memory_space<vmem>>, vector<1x128x128xbf16>
    %1 = vector.shape_cast %0 : vector<1x128x128xbf16> to vector<128x128xbf16>
    %c0_2 = arith.constant 0 : index
    %c0_3 = arith.constant 0 : index
    %c0_4 = arith.constant 0 : index
    %2 = vector.load %arg3[%c0_2, %c0_3, %c0_4] : memref<1x1x128xf32, #tpu.memory_space<vmem>>, vector<1x1x128xf32>
    %3 = vector.shape_cast %2 : vector<1x1x128xf32> to vector<1x128xf32>
    %c0_5 = arith.constant 0 : index
    %c0_6 = arith.constant 0 : index
    %c0_7 = arith.constant 0 : index
    %4 = vector.load %arg2[%c0_5, %c0_6, %c0_7] : memref<1x1x128xf32, #tpu.memory_space<vmem>>, vector<1x1x128xf32>
    %5 = vector.shape_cast %4 : vector<1x1x128xf32> to vector<1x128xf32>
    %6 = arith.mulf %5, %3 : vector<1x128xf32>
    %7 = arith.truncf %6 : vector<1x128xf32> to vector<1x128xbf16>
    %cst = arith.constant dense<0.000000e+00> : vector<1x128xf32>
    %8 = tpu.matmul %7, %1, %cst {dimension_numbers = #tpu.dot_dimension_numbers<[1], [0], [0], [1], [0, 0, 1, 1], [], []>} : vector<1x128xbf16>, vector<128x128xbf16>, vector<1x128xf32> -> vector<1x128xf32>
    %9 = arith.mulf %8, %3 : vector<1x128xf32>
    %c0_8 = arith.constant 0 : index
    %10 = memref.load %arg4[%c0_8] : memref<10xf32, #tpu.memory_space<smem>>
    %11 = vector.broadcast %10 : f32 to vector<1x128xf32>
    %12 = arith.mulf %11, %9 : vector<1x128xf32>
    %c3 = arith.constant 3 : index
    %13 = memref.load %arg4[%c3] : memref<10xf32, #tpu.memory_space<smem>>
    %14 = vector.broadcast %13 : f32 to vector<1x128xf32>
    %15 = arith.addf %12, %14 : vector<1x128xf32>
    %cst_9 = arith.constant 0.000000e+00 : f32
    %16 = vector.broadcast %cst_9 : f32 to vector<1x128xf32>
    %17 = arith.maximumf %15, %16 : vector<1x128xf32>
    %c1 = arith.constant 1 : index
    %18 = memref.load %arg4[%c1] : memref<10xf32, #tpu.memory_space<smem>>
    %19 = vector.broadcast %18 : f32 to vector<1x128xf32>
    %20 = arith.mulf %19, %9 : vector<1x128xf32>
    %c4 = arith.constant 4 : index
    %21 = memref.load %arg4[%c4] : memref<10xf32, #tpu.memory_space<smem>>
    %22 = vector.broadcast %21 : f32 to vector<1x128xf32>
    %23 = arith.addf %20, %22 : vector<1x128xf32>
    %cst_10 = arith.constant 0.000000e+00 : f32
    %24 = vector.broadcast %cst_10 : f32 to vector<1x128xf32>
    %25 = arith.maximumf %23, %24 : vector<1x128xf32>
    %c2 = arith.constant 2 : index
    %26 = memref.load %arg4[%c2] : memref<10xf32, #tpu.memory_space<smem>>
    %27 = vector.broadcast %26 : f32 to vector<1x128xf32>
    %28 = arith.mulf %27, %9 : vector<1x128xf32>
    %c5 = arith.constant 5 : index
    %29 = memref.load %arg4[%c5] : memref<10xf32, #tpu.memory_space<smem>>
    %30 = vector.broadcast %29 : f32 to vector<1x128xf32>
    %31 = arith.addf %28, %30 : vector<1x128xf32>
    %cst_11 = arith.constant 0.000000e+00 : f32
    %32 = vector.broadcast %cst_11 : f32 to vector<1x128xf32>
    %33 = arith.maximumf %31, %32 : vector<1x128xf32>
    %34 = tpu.concatenate %17, %25, %33 in 0 : vector<1x128xf32>, vector<1x128xf32>, vector<1x128xf32> -> vector<3x128xf32>
    %35 = vector.broadcast %3 : vector<1x128xf32> to vector<3x128xf32>
    %36 = arith.mulf %34, %35 : vector<3x128xf32>
    %37 = arith.truncf %36 : vector<3x128xf32> to vector<3x128xbf16>
    %cst_12 = arith.constant dense<0.000000e+00> : vector<3x128xf32>
    %38 = tpu.matmul %37, %1, %cst_12 {dimension_numbers = #tpu.dot_dimension_numbers<[1], [0], [0], [1], [0, 0, 1, 1], [], []>} : vector<3x128xbf16>, vector<128x128xbf16>, vector<3x128xf32> -> vector<3x128xf32>
    %39 = vector.broadcast %3 : vector<1x128xf32> to vector<3x128xf32>
    %40 = arith.mulf %38, %39 : vector<3x128xf32>
    %c6 = arith.constant 6 : index
    %41 = memref.load %arg4[%c6] : memref<10xf32, #tpu.memory_space<smem>>
    %42 = vector.extract_strided_slice %40 {offsets = [0, 0], sizes = [1, 128], strides = [1, 1]} : vector<3x128xf32> to vector<1x128xf32>
    %43 = vector.broadcast %41 : f32 to vector<1x128xf32>
    %44 = arith.mulf %43, %42 : vector<1x128xf32>
    %c7 = arith.constant 7 : index
    %45 = memref.load %arg4[%c7] : memref<10xf32, #tpu.memory_space<smem>>
    %46 = vector.extract_strided_slice %40 {offsets = [1, 0], sizes = [1, 128], strides = [1, 1]} : vector<3x128xf32> to vector<1x128xf32>
    %47 = vector.broadcast %45 : f32 to vector<1x128xf32>
    %48 = arith.mulf %47, %46 : vector<1x128xf32>
    %49 = arith.addf %44, %48 : vector<1x128xf32>
    %c8 = arith.constant 8 : index
    %50 = memref.load %arg4[%c8] : memref<10xf32, #tpu.memory_space<smem>>
    %51 = vector.extract_strided_slice %40 {offsets = [2, 0], sizes = [1, 128], strides = [1, 1]} : vector<3x128xf32> to vector<1x128xf32>
    %52 = vector.broadcast %50 : f32 to vector<1x128xf32>
    %53 = arith.mulf %52, %51 : vector<1x128xf32>
    %54 = arith.addf %49, %53 : vector<1x128xf32>
    %c9 = arith.constant 9 : index
    %55 = memref.load %arg4[%c9] : memref<10xf32, #tpu.memory_space<smem>>
    %56 = vector.broadcast %55 : f32 to vector<1x128xf32>
    %57 = arith.addf %54, %56 : vector<1x128xf32>
    %cst_13 = arith.constant 0.000000e+00 : f32
    %58 = vector.broadcast %cst_13 : f32 to vector<1x128xf32>
    %59 = arith.maximumf %57, %58 : vector<1x128xf32>
    %c0_14 = arith.constant 0 : index
    %c0_15 = arith.constant 0 : index
    %c0_16 = arith.constant 0 : index
    %60 = vector.load %arg5[%c0_14, %c0_15, %c0_16] : memref<1x1x128xf32, #tpu.memory_space<vmem>>, vector<1x1x128xf32>
    %61 = vector.shape_cast %60 : vector<1x1x128xf32> to vector<1x128xf32>
    %62 = vector.shape_cast %59 : vector<1x128xf32> to vector<1x1x128xf32>
    tpu.vector_store %arg5[%c0_14, %c0_15, %c0_16], %62 {strides = array<i32>} : memref<1x1x128xf32, #tpu.memory_space<vmem>>, vector<1x1x128xf32>,
    return
  }
  func.func @transform_0(%arg0: i32) -> (i32, i32, i32) {
    %c0_i32 = arith.constant 0 : i32
    %c0_i32_0 = arith.constant 0 : i32
    %c0_i32_1 = arith.constant 0 : i32
    return %arg0, %c0_i32, %c0_i32_0 : i32, i32, i32
  }
  func.func @transform_1(%arg0: i32) -> (i32, i32, i32) {
    %c0_i32 = arith.constant 0 : i32
    %c0_i32_0 = arith.constant 0 : i32
    %c0_i32_1 = arith.constant 0 : i32
    return %arg0, %c0_i32, %c0_i32_0 : i32, i32, i32
  }
  func.func @transform_2(%arg0: i32) -> (i32, i32, i32) {
    %c0_i32 = arith.constant 0 : i32
    %c0_i32_0 = arith.constant 0 : i32
    %c0_i32_1 = arith.constant 0 : i32
    return %arg0, %c0_i32, %c0_i32_0 : i32, i32, i32
  }
  func.func @transform_3(%arg0: i32) -> i32 {
    %c0_i32 = arith.constant 0 : i32
    %c0_i32_0 = arith.constant 0 : i32
    return %c0_i32 : i32
  }
  func.func @transform_4(%arg0: i32) -> (i32, i32, i32) {
    %c0_i32 = arith.constant 0 : i32
    %c0_i32_0 = arith.constant 0 : i32
    %c0_i32_1 = arith.constant 0 : i32
    return %arg0, %c0_i32, %c0_i32_0 : i32, i32, i32
  }
}

</mosaic_0001>

<bundles_post_ra>
// kernel: gcn_protein_forward.1
= control target key start
LH: loop header
LB: loop body
LE: loop exit
PB: predicated region body
PF: predicated region fallthrough
CT: control target
= control target key end

     0   :  { %9 = vsyncpa [#allocation3], 0  ;;  %s254_s18 = smov [#allocation2]   ;;  %s319_s0 = inlined_call_operand.vmem [shape: bf16[1,128,128], index: 0, kind: input, shape index: {}]   ;;  %s320_s1 = inlined_call_operand.vmem [shape: f32[1,1,128], index: 1, kind: input, shape index: {}]   ;;  %s321_s2 = inlined_call_operand.vmem [shape: f32[1,1,128], index: 2, kind: input, shape index: {}]   ;;  %s322_s3 = inlined_call_operand.vmem [shape: f32[10], index: 3, kind: input, shape index: {}]   ;;  %s323_s4 = inlined_call_operand.vmem [shape: f32[1,1,128], index: 4, kind: output, shape index: {}]  }
   0x1   :  { %s21_s17 = sshll.u32 %s322_s3, 4  ;;  %s22_s17 = int_to_ptr.vmem [resolvable:$true] %s21_s17 }
   0x2   :  { %24 = dma.vmem_to_smem %s22_s17, 16, %s254_s18, [#allocation3]  }
   0x3   :  { %252 = dma.done.wait [#allocation3], 16  }
   0x4   :  { %253 = vsyncadd [#allocation3], 4294967280 }
   0x5   :  { %29 = sfence }
   0x6   :  { %v237_v0 = vld [vmem:[%s319_s0 + $0x38] sm:$0xff]  ;;  %v236_v1 = vld [vmem:[%s319_s0 + $0x30] sm:$0xff]  ;;  %v235_v2 = vld [vmem:[%s319_s0 + $0x28] sm:$0xff]  ;;  %s112_s12 = sld [smem:[#allocation2]]  ;;  %vm139_vm0 = vcmask 1040384   ;;  %vm141_vm1 = vcmask 1041408  }
   0x7   :  { %98 = vmatpush.bf16.msra.mxu0 %v237_v0  ;;  %148 = vmatpush.bf16.msra.mxu1 %v237_v0  ;;  %v234_v3 = vld [vmem:[%s319_s0 + $0x20] sm:$0xff]  ;;  %v233_v4 = vld [vmem:[%s319_s0 + $0x18] sm:$0xff]  ;;  %v232_v5 = vld [vmem:[%s319_s0 + $0x10] sm:$0xff]  ;;  %s222_s13 = sld [smem:[#allocation2 + $0x1]] }
   0x8   :  { %v231_v6 = vld [vmem:[%s319_s0 + $0x8] sm:$0xff]  ;;  %v46_v7 = vld [vmem:[%s321_s2] sm:$0x1]  ;;  %s221_s14 = sld [smem:[#allocation2 + $0x3]] }
   0x9   :  { %v47_v8 = vld [vmem:[%s320_s1] sm:$0x1]  ;;  %s224_s15 = sld [smem:[#allocation2 + $0x2]] }
   0xa   :  { %v48_v9 = vmul.f32 %v47_v8, %v46_v7  ;;  %v230_v10 = vld [vmem:[%s319_s0] sm:$0xff]  ;;  %s223_s16 = sld [smem:[#allocation2 + $0x4]] }
   0xb   :  { %99 = vmatpush.bf16.msra.mxu0 %v236_v1  ;;  %149 = vmatpush.bf16.msra.mxu1 %v236_v1  ;;  %s225_s17 = sld [smem:[#allocation2 + $0x5]]  ;;  %v239_v32 = vld [vmem:[%s321_s2] ss:$0 sm:$0xff] }
   0xc   :  { %v49_v11 = vpack.c.bf16 %v48_v9, %v48_v9  ;;  %v113_v13 = vstv %s112_s12  ;;  %s227_s18 = sld [smem:[#allocation2 + $0x7]] }
   0xd   :  { %v120_v14 = vstv %s222_s13  ;;  %s228_s19 = sld [smem:[#allocation2 + $0x8]] }
   0xe   :  { %v116_v17 = vstv %s221_s14  ;;  %s226_s20 = sld [smem:[#allocation2 + $0x6]] }
   0xf   :  { %100 = vmatpush.bf16.msra.mxu0 %v235_v2  ;;  %150 = vmatpush.bf16.msra.mxu1 %v235_v2  ;;  %v127_v15 = vstv %s224_s15  ;;  %s229_s21 = sld [smem:[#allocation2 + $0x9]] }
  0x10   :  { %v123_v18 = vstv %s223_s16 }
  0x11   :  { %v130_v19 = vstv %s225_s17 }
  0x12   :  { %v166_v38 = vstv %s227_s18 }
  0x13   :  { %101 = vmatpush.bf16.msra.mxu0 %v234_v3  ;;  %151 = vmatpush.bf16.msra.mxu1 %v234_v3  ;;  %v173_v39 = vstv %s228_s19 }
  0x14   :  { %v163_v41 = vstv %s226_s20 }
  0x15   :  { %v180_v48 = vstv %s229_s21 }
  0x17   :  { %102 = vmatpush.bf16.msra.mxu0 %v233_v4  ;;  %152 = vmatpush.bf16.msra.mxu1 %v233_v4 }
  0x1b   :  { %103 = vmatpush.bf16.msra.mxu0 %v232_v5  ;;  %153 = vmatpush.bf16.msra.mxu1 %v232_v5 }
  0x1f   :  { %104 = vmatpush.bf16.msra.mxu0 %v231_v6  ;;  %154 = vmatpush.bf16.msra.mxu1 %v231_v6 }
  0x23   :  { %105 = vmatpush.bf16.msra.mxu0 %v230_v10  ;;  %155 = vmatpush.bf16.msra.mxu1 %v230_v10 }
  0x26   :  { %106 = vmatmul.bf16.vlgmr.msra.gmra.mxu0 %v49_v11 }
  0xa3   :  { %v107_v12 = vpop.f32.mrf.mxu0 }
  0xa4   :  { %v111_v16 = vmul.f32 %v107_v12, %v46_v7 }
  0xa6   :  { %v114_v20 = vmul.f32 %v113_v13, %v111_v16  ;;  %v121_v21 = vmul.f32 %v120_v14, %v111_v16  ;;  %v128_v22 = vmul.f32 %v127_v15, %v111_v16 }
  0xa8   :  { %v117_v23 = vadd.f32 %v116_v17, %v114_v20  ;;  %v124_v24 = vadd.f32 %v123_v18, %v121_v21  ;;  %v131_v25 = vadd.f32 %v130_v19, %v128_v22 }
  0xaa   :  { %v125_v26 = vmax.f32 %v124_v24, 0.0  ;;  %v132_v27 = vmax.f32 %v131_v25, 0.0  ;;  %v118_v29 = vmax.f32 %v117_v23, 0.0 }
  0xab   :  { %v109_v28 = vpop.f32.mrf.mxu0 }
  0xac   :  { %v134_v30 = vrot.slane %v125_v26, 7  ;;  %v137_v31 = vrot.slane %v132_v27, 6 }
  0xae   :  { %v140_v33 = vsel %vm139_vm0, %v118_v29, %v134_v30 }
  0xaf   :  { %v142_v34 = vsel %vm141_vm1, %v140_v33, %v137_v31 }
  0xb0   :  { %v146_v35 = vmul.f32 %v239_v32, %v142_v34 }
  0xb2   :  { %v147_v36 = vpack.c.bf16 %v146_v35, %v146_v35 }
  0xb4   :  { %156 = vmatmul.bf16.vlgmr.msra.gmra.mxu1 %v147_v36 }
 0x131   :  { %v157_v37 = vpop.f32.mrf.mxu1 }
 0x132   :  { %v161_v40 = vmul.f32 %v239_v32, %v157_v37 }
 0x134   :  { %v167_v42 = vmul.f32 %v166_v38, %v161_v40  ;;  %v174_v43 = vmul.f32 %v173_v39, %v161_v40  ;;  %v164_v44 = vmul.f32 %v163_v41, %v161_v40 }
 0x136   :  { %v169_v45 = vrot.slane %v167_v42, 1  ;;  %v176_v47 = vrot.slane %v174_v43, 2 }
 0x138   :  { %v171_v46 = vadd.f32 %v169_v45, %v164_v44 }
 0x139   :  { %v159_v49 = vpop.f32.mrf.mxu1 }
 0x13a   :  { %v178_v50 = vadd.f32 %v176_v47, %v171_v46 }
 0x13c   :  { %v181_v51 = vadd.f32 %v180_v48, %v178_v50 }
 0x13e   :  { %v182_v52 = vmax.f32 %v181_v51, 0.0 }
 0x140   :  { %183 = vst [vmem:[%s323_s4] sm:$0x1] %v182_v52 }
 0x141   :  { %188 = vsyncpa [#allocation3], 1 }

</bundles_post_ra>
